<compile_context>
chip_gen: v7x
topology: tpu7x:2x2x1
jax: 0.10.0
libtpu: 0.0.40
codegen_flags: <defaults>
</compile_context>

<pallas_src>
import functools

import jax
import jax.numpy as jnp
from jax import lax
from jax.experimental import pallas as pl
from jax.experimental.pallas import tpu as pltpu

FEAT_DIM = 2048      # ResNet-50 feature dim (ProjectionHead input_dim)
PROJ_DIM = 128       # ProjectionHead output_dim
TEMPERATURE = 0.5    # NTXentLossWithAnchor default
INV_T = 1.0 / TEMPERATURE
EPS = 1e-8           # torch.nn.CosineSimilarity eps
NEG_INIT = -1e30     # finite "minus infinity": empty partials never hit inf - inf


def _cdiv(a, b):
    return -(-a // b)


# ---------------------------------------------------------------------------
# Pallas kernel 1: ProjectionHead  ->  Linear(2048,128) -> ReLU -> Linear(128,128)
# Row-tiled over M (ragged last block, no pad pass); weights VMEM-resident.
# ---------------------------------------------------------------------------
def _projection_kernel(x_ref, w1_ref, b1_ref, w2_ref, b2_ref, o_ref):
    # x_ref: (TM, 2048) bf16, w1_ref: (2048, 128) bf16 -> f32 accumulate on MXU.
    h = jnp.dot(x_ref[...], w1_ref[...], preferred_element_type=jnp.float32)
    h = jnp.maximum(h + b1_ref[...], 0.0)                      # bias + ReLU (f32)
    # Second matmul: bf16 operands (keeps v5e's MXU passes short), f32 accumulate.
    o_ref[...] = (jnp.dot(h.astype(jnp.bfloat16), w2_ref[...],
                          preferred_element_type=jnp.float32) + b2_ref[...])


def projection_head(x, w1, b1, w2, b2, *, tm=2048):
    """x: (M, 2048) f32/bf16 -> (M, 128) f32."""
    m = x.shape[0]
    x_bf = x.astype(jnp.bfloat16)          # no-op if the caller already cast
    w1_bf = w1.astype(jnp.bfloat16)
    w2_bf = w2.astype(jnp.bfloat16)

    # Keep row-block a multiple of 16 (bf16 sublane packing).  Only degenerate
    # tiny batches are padded; normal sizes use a ragged last block instead.
    m_arr = m
    if m < 16:
        x_bf = jnp.pad(x_bf, ((0, 16 - m), (0, 0)))
        m_arr = 16
    tm_eff = min(tm, (m_arr // 16) * 16)
    grid_m = _cdiv(m_arr, tm_eff)

    out = pl.pallas_call(
        _projection_kernel,
        out_shape=jax.ShapeDtypeStruct((m_arr, PROJ_DIM), jnp.float32),
        grid=(grid_m,),
        in_specs=[
            pl.BlockSpec((tm_eff, FEAT_DIM), lambda i: (i, 0)),    # streamed rows
            pl.BlockSpec((FEAT_DIM, PROJ_DIM), lambda i: (0, 0)),  # resident weights
            pl.BlockSpec((1, PROJ_DIM), lambda i: (0, 0)),
            pl.BlockSpec((PROJ_DIM, PROJ_DIM), lambda i: (0, 0)),
            pl.BlockSpec((1, PROJ_DIM), lambda i: (0, 0)),
        ],
        out_specs=pl.BlockSpec((tm_eff, PROJ_DIM), lambda i: (i, 0)),
        compiler_params=pltpu.CompilerParams(
            dimension_semantics=("parallel",),          # megacore row sharding
            vmem_limit_bytes=48 * 1024 * 1024),         # tm=2048 bf16 ~19 MiB dbl-buf
    )(x_bf, w1_bf, b1, w2_bf, b2)
    return out[:m] if m_arr != m else out


# ---------------------------------------------------------------------------
# Pallas kernel 2: streaming online log-sum-exp over the negative logits.
#   sim_neg = (zi / T) @ z_neg^T   (B, NB), tiled over NB rows of z_neg (bf16)
# Emits per-(core, row) partial (m, l); sim_pos / final CE combine is tiny
# wrapper math.
# ---------------------------------------------------------------------------
def _neg_lse_kernel(zi_ref, neg_ref, m_ref, l_ref, *,
                    nb_true, tn, n_tiles, kt, ragged):
    c = pl.program_id(0)
    k = pl.program_id(1)
    gt = c * kt + k                                 # logical negatives-tile index

    @pl.when(k == 0)
    def _init():
        m_ref[...] = jnp.full(m_ref.shape, NEG_INIT, dtype=jnp.float32)
        l_ref[...] = jnp.zeros(l_ref.shape, dtype=jnp.float32)

    # zi is tiny & resident: scale by 1/T and cast to bf16 once per step.
    zi_bf = (zi_ref[...] * INV_T).astype(jnp.bfloat16)

    def _logits():
        # (B, 128) x (tn, 128) contracting the last dims -> (B, tn); f32 acc.
        return lax.dot_general(zi_bf, neg_ref[...],
                               dimension_numbers=(((1,), (1,)), ((), ())),
                               preferred_element_type=jnp.float32)

    def _update(s):
        m_prev = m_ref[0]
        m_new = jnp.maximum(m_prev, jnp.max(s, axis=-1, keepdims=True))
        l_ref[0] = (l_ref[0] * jnp.exp(m_prev - m_new)
                    + jnp.sum(jnp.exp(s - m_new), axis=-1, keepdims=True))
        m_ref[0] = m_new

    interior_limit = n_tiles - 1 if ragged else n_tiles
    if interior_limit > 0:
        @pl.when(gt < interior_limit)               # full tiles: no mask work
        def _interior():
            _update(_logits())

    if ragged:
        @pl.when(gt == n_tiles - 1)                 # edge tile only: -inf mask
        def _edge():
            s = _logits()
            col = (n_tiles - 1) * tn + lax.broadcasted_iota(jnp.int32, s.shape, 1)
            _update(jnp.where(col < nb_true, s, -jnp.inf))
    # gt >= n_tiles (overflow slots from the core split) are no-ops.


def ntxent_loss(zi, zj, z_neg, *, tn=4096, n_cores=2):
    """zi, zj: (B, 128) f32; z_neg: (NB, 128) f32 -> scalar NT-Xent loss."""
    b = zi.shape[0]
    nb = z_neg.shape[0]

    # sim_pos = cos_sim(zi, zj) / T  — tiny (B,128) work, plain JAX.
    dot_ij = jnp.sum(zi * zj, axis=-1)
    ni2 = jnp.sum(zi * zi, axis=-1)
    nj2 = jnp.sum(zj * zj, axis=-1)
    # sqrt(max(ni2*nj2, eps^2)) == max(||zi||*||zj||, eps)  (torch clamp)
    sim_pos = dot_ij * lax.rsqrt(jnp.maximum(ni2 * nj2, EPS * EPS)) * INV_T   # (B,)

    # bf16 negatives stream (halves HBM bytes of the dominant array).
    neg_bf = z_neg.astype(jnp.bfloat16)
    nb_arr = nb
    if nb < 16:                                    # only degenerate tiny counts
        neg_bf = jnp.pad(neg_bf, ((0, 16 - nb), (0, 0)))
        nb_arr = 16
    tn_eff = min(tn, (nb_arr // 16) * 16)
    n_tiles = _cdiv(nb, tn_eff)                    # tiles covering true negatives
    kt = _cdiv(n_tiles, n_cores)                   # tiles per core
    ragged = (nb % tn_eff) != 0

    kernel = functools.partial(_neg_lse_kernel, nb_true=nb, tn=tn_eff,
                               n_tiles=n_tiles, kt=kt, ragged=ragged)
    m_part, l_part = pl.pallas_call(
        kernel,
        out_shape=(jax.ShapeDtypeStruct((n_cores, b, 1), jnp.float32),
                   jax.ShapeDtypeStruct((n_cores, b, 1), jnp.float32)),
        grid=(n_cores, kt),
        in_specs=[
            pl.BlockSpec((b, PROJ_DIM), lambda c, k: (0, 0)),      # zi resident
            pl.BlockSpec((tn_eff, PROJ_DIM),                       # streamed rows
                         lambda c, k: (jnp.minimum(c * kt + k, n_tiles - 1), 0)),
        ],
        out_specs=(pl.BlockSpec((1, b, 1), lambda c, k: (c, 0, 0)),
                   pl.BlockSpec((1, b, 1), lambda c, k: (c, 0, 0))),
        compiler_params=pltpu.CompilerParams(
            dimension_semantics=("parallel", "arbitrary"),   # split NB across TCs
            vmem_limit_bytes=48 * 1024 * 1024),
    )(zi, neg_bf)

    # Combine per-core partial LSE states with sim_pos (cross-entropy, label 0).
    m_part = m_part[..., 0]                                   # (NC, B)
    l_part = l_part[..., 0]
    m_tot = jnp.maximum(sim_pos, jnp.max(m_part, axis=0))     # (B,)
    l_tot = (jnp.exp(sim_pos - m_tot)
             + jnp.sum(l_part * jnp.exp(m_part - m_tot), axis=0))
    lse = m_tot + jnp.log(l_tot)
    return jnp.mean(lse - sim_pos)


# ---------------------------------------------------------------------------
# Backbone stub (plain JAX glue) — stands in for ResNet-50 / RetinaNet backbones.
# ---------------------------------------------------------------------------
def backbone_stub(x, w_emb):
    # x: (B, C, H, W) NCHW -> global average pool -> linear embed to FEAT_DIM
    pooled = jnp.mean(x, axis=(2, 3))          # (B, C)
    return pooled @ w_emb                      # (B, FEAT_DIM)


# ---------------------------------------------------------------------------
# Full ContrastiveLearningModel.forward
# ---------------------------------------------------------------------------
def contrastive_forward(xi, xj, negatives, w_emb, w1, b1, w2, b2):
    b = xi.shape[0]
    n = negatives.shape[0]

    ri = backbone_stub(xi, w_emb)                                           # (B, 2048)
    rj = backbone_stub(xj, w_emb)                                           # (B, 2048) (RetinaNet path stubbed)
    r_neg = backbone_stub(negatives.reshape((n * b,) + negatives.shape[2:]),
                          w_emb)                                            # (N*B, 2048)

    # Cast each piece to bf16 so the convert fuses into the concatenate
    # (no separate f32 round trip of the largest activation matrix).
    feats_bf = jnp.concatenate([ri.astype(jnp.bfloat16),
                                rj.astype(jnp.bfloat16),
                                r_neg.astype(jnp.bfloat16)], axis=0)        # (2B+N*B, 2048)

    # One row-tiled projection-head kernel over all rows (shared weights).
    z = projection_head(feats_bf, w1, b1, w2, b2)
    zi = z[:b]                                                              # (B, 128)
    zj = z[b:2 * b]                                                         # (B, 128)
    # anchor_negative.view(-1, 128) -> (N*B, 128); the PyTorch forward recomputes
    # it twice with identical results, a single pass suffices.  Row tiles are
    # streamed directly (no transpose / pad pass over the negatives matrix).
    z_neg = z[2 * b:]

    return ntxent_loss(zi, zj, z_neg)


# ---------------------------------------------------------------------------
# Pure-JAX reference (same bf16 strategy) for validation.
# ---------------------------------------------------------------------------
def reference_forward(xi, xj, negatives, w_emb, w1, b1, w2, b2):
    b = xi.shape[0]
    n = negatives.shape[0]
    ri = backbone_stub(xi, w_emb)
    rj = backbone_stub(xj, w_emb)
    r_neg = backbone_stub(negatives.reshape((n * b,) + negatives.shape[2:]), w_emb)
    feats = jnp.concatenate([ri, rj, r_neg], axis=0).astype(jnp.bfloat16)
    h = jnp.dot(feats, w1.astype(jnp.bfloat16),
                preferred_element_type=jnp.float32) + b1
    h = jnp.maximum(h, 0.0)
    z = jnp.dot(h.astype(jnp.bfloat16), w2.astype(jnp.bfloat16),
                preferred_element_type=jnp.float32) + b2
    zi, zj, z_neg = z[:b], z[b:2 * b], z[2 * b:]
    dot_ij = jnp.sum(zi * zj, axis=-1)
    denom = jnp.maximum(jnp.linalg.norm(zi, axis=-1) * jnp.linalg.norm(zj, axis=-1), EPS)
    sim_pos = dot_ij / denom / TEMPERATURE
    sim_neg = jnp.dot((zi * INV_T).astype(jnp.bfloat16),
                      z_neg.astype(jnp.bfloat16).T,
                      preferred_element_type=jnp.float32)
    logits = jnp.concatenate([sim_pos[:, None], sim_neg], axis=1)
    lse = jax.scipy.special.logsumexp(logits, axis=-1)
    return jnp.mean(lse - sim_pos)


if __name__ == "__main__":
    key = jax.random.PRNGKey(0)
    ks = jax.random.split(key, 8)

    B, C, H, W = 2, 3, 16, 16
    N_NEG = 2

    xi = jax.random.normal(ks[0], (B, C, H, W), jnp.float32)
    xj = jax.random.normal(ks[1], (B, C, H, W), jnp.float32)
    negatives = jax.random.normal(ks[2], (N_NEG, B, C, H, W), jnp.float32)

    # Deterministic parameter init (synthetic; no checkpoint loading).
    w_emb = jax.random.normal(ks[3], (C, FEAT_DIM), jnp.float32) * 0.05
    w1 = jax.random.normal(ks[4], (FEAT_DIM, PROJ_DIM), jnp.float32) * (FEAT_DIM ** -0.5)
    b1 = jax.random.normal(ks[5], (1, PROJ_DIM), jnp.float32) * 0.01
    w2 = jax.random.normal(ks[6], (PROJ_DIM, PROJ_DIM), jnp.float32) * (PROJ_DIM ** -0.5)
    b2 = jax.random.normal(ks[7], (1, PROJ_DIM), jnp.float32) * 0.01

    loss = jax.jit(contrastive_forward)(xi, xj, negatives, w_emb, w1, b1, w2, b2)
    jax.block_until_ready(loss)
    assert loss.shape == () and bool(jnp.isfinite(loss))

    ref = reference_forward(xi, xj, negatives, w_emb, w1, b1, w2, b2)
    jax.block_until_ready(ref)
    assert jnp.allclose(loss, ref, rtol=2e-3, atol=2e-3), (loss, ref)

    print("KERNEL_OK")
</pallas_src>

<mosaic_0001>
module attributes {stable_mosaic.version = 11 : i64} {
  func.func @_projection_kernel(%arg0: i32, %arg1: memref<16x2048xbf16, #tpu.memory_space<vmem>>, %arg2: memref<2048x128xbf16, #tpu.memory_space<vmem>>, %arg3: memref<1x128xf32, #tpu.memory_space<vmem>>, %arg4: memref<128x128xbf16, #tpu.memory_space<vmem>>, %arg5: memref<1x128xf32, #tpu.memory_space<vmem>>, %arg6: memref<16x128xf32, #tpu.memory_space<vmem>>) attributes {dimension_semantics = [#tpu.dimension_semantics<parallel>], iteration_bounds = array<i64: 1>, scalar_prefetch = 0 : i64, scratch_operands = 0 : i64, tpu.core_type = #tpu.core_type<tc>, window_params = [{transform_indices = @transform_0, window_bounds = array<i64: 16, 2048>}, {pipeline_mode = #tpu.pipeline_mode<synchronous>, transform_indices = @transform_1, window_bounds = array<i64: 2048, 128>}, {pipeline_mode = #tpu.pipeline_mode<synchronous>, transform_indices = @transform_2, window_bounds = array<i64: 1, 128>}, {pipeline_mode = #tpu.pipeline_mode<synchronous>, transform_indices = @transform_3, window_bounds = array<i64: 128, 128>}, {pipeline_mode = #tpu.pipeline_mode<synchronous>, transform_indices = @transform_4, window_bounds = array<i64: 1, 128>}, {transform_indices = @transform_5, window_bounds = array<i64: 16, 128>}]} {
    %c0 = arith.constant 0 : index
    %c0_0 = arith.constant 0 : index
    %0 = vector.load %arg1[%c0, %c0_0] : memref<16x2048xbf16, #tpu.memory_space<vmem>>, vector<16x2048xbf16>
    %c0_1 = arith.constant 0 : index
    %c0_2 = arith.constant 0 : index
    %1 = vector.load %arg2[%c0_1, %c0_2] : memref<2048x128xbf16, #tpu.memory_space<vmem>>, vector<2048x128xbf16>
    %cst = arith.constant dense<0.000000e+00> : vector<16x128xf32>
    %2 = tpu.matmul %0, %1, %cst {dimension_numbers = #tpu.dot_dimension_numbers<[1], [0], [0], [1], [0, 0, 1, 1], [], []>} : vector<16x2048xbf16>, vector<2048x128xbf16>, vector<16x128xf32> -> vector<16x128xf32>
    %c0_3 = arith.constant 0 : index
    %c0_4 = arith.constant 0 : index
    %3 = vector.load %arg3[%c0_3, %c0_4] : memref<1x128xf32, #tpu.memory_space<vmem>>, vector<1x128xf32>
    %4 = vector.broadcast %3 : vector<1x128xf32> to vector<16x128xf32>
    %5 = arith.addf %2, %4 : vector<16x128xf32>
    %cst_5 = arith.constant 0.000000e+00 : f32
    %6 = vector.broadcast %cst_5 : f32 to vector<16x128xf32>
    %7 = arith.maximumf %5, %6 : vector<16x128xf32>
    %8 = arith.truncf %7 : vector<16x128xf32> to vector<16x128xbf16>
    %c0_6 = arith.constant 0 : index
    %c0_7 = arith.constant 0 : index
    %9 = vector.load %arg4[%c0_6, %c0_7] : memref<128x128xbf16, #tpu.memory_space<vmem>>, vector<128x128xbf16>
    %cst_8 = arith.constant dense<0.000000e+00> : vector<16x128xf32>
    %10 = tpu.matmul %8, %9, %cst_8 {dimension_numbers = #tpu.dot_dimension_numbers<[1], [0], [0], [1], [0, 0, 1, 1], [], []>} : vector<16x128xbf16>, vector<128x128xbf16>, vector<16x128xf32> -> vector<16x128xf32>
    %c0_9 = arith.constant 0 : index
    %c0_10 = arith.constant 0 : index
    %11 = vector.load %arg5[%c0_9, %c0_10] : memref<1x128xf32, #tpu.memory_space<vmem>>, vector<1x128xf32>
    %12 = vector.broadcast %11 : vector<1x128xf32> to vector<16x128xf32>
    %13 = arith.addf %10, %12 : vector<16x128xf32>
    %c0_11 = arith.constant 0 : index
    %c0_12 = arith.constant 0 : index
    %14 = vector.load %arg6[%c0_11, %c0_12] : memref<16x128xf32, #tpu.memory_space<vmem>>, vector<16x128xf32>
    tpu.vector_store %arg6[%c0_11, %c0_12], %13 {strides = array<i32>} : memref<16x128xf32, #tpu.memory_space<vmem>>, vector<16x128xf32>,
    return
  }
  func.func @transform_0(%arg0: i32) -> (i32, i32) {
    %c0_i32 = arith.constant 0 : i32
    %c0_i32_0 = arith.constant 0 : i32
    return %arg0, %c0_i32 : i32, i32
  }
  func.func @transform_1(%arg0: i32) -> (i32, i32) {
    %c0_i32 = arith.constant 0 : i32
    %c0_i32_0 = arith.constant 0 : i32
    %c0_i32_1 = arith.constant 0 : i32
    return %c0_i32, %c0_i32_0 : i32, i32
  }
  func.func @transform_2(%arg0: i32) -> (i32, i32) {
    %c0_i32 = arith.constant 0 : i32
    %c0_i32_0 = arith.constant 0 : i32
    %c0_i32_1 = arith.constant 0 : i32
    return %c0_i32, %c0_i32_0 : i32, i32
  }
  func.func @transform_3(%arg0: i32) -> (i32, i32) {
    %c0_i32 = arith.constant 0 : i32
    %c0_i32_0 = arith.constant 0 : i32
    %c0_i32_1 = arith.constant 0 : i32
    return %c0_i32, %c0_i32_0 : i32, i32
  }
  func.func @transform_4(%arg0: i32) -> (i32, i32) {
    %c0_i32 = arith.constant 0 : i32
    %c0_i32_0 = arith.constant 0 : i32
    %c0_i32_1 = arith.constant 0 : i32
    return %c0_i32, %c0_i32_0 : i32, i32
  }
  func.func @transform_5(%arg0: i32) -> (i32, i32) {
    %c0_i32 = arith.constant 0 : i32
    %c0_i32_0 = arith.constant 0 : i32
    return %arg0, %c0_i32 : i32, i32
  }
}

module attributes {stable_mosaic.version = 11 : i64} {
  func.func @_neg_lse_kernel(%arg0: i32, %arg1: i32, %arg2: memref<2x128xf32, #tpu.memory_space<vmem>>, %arg3: memref<16x128xbf16, #tpu.memory_space<vmem>>, %arg4: memref<1x2x1xf32, #tpu.memory_space<vmem>>, %arg5: memref<1x2x1xf32, #tpu.memory_space<vmem>>) attributes {dimension_semantics = [#tpu.dimension_semantics<parallel>, #tpu.dimension_semantics<arbitrary>], iteration_bounds = array<i64: 2, 1>, scalar_prefetch = 0 : i64, scratch_operands = 0 : i64, tpu.core_type = #tpu.core_type<tc>, window_params = [{pipeline_mode = #tpu.pipeline_mode<synchronous>, transform_indices = @transform_0, window_bounds = array<i64: 2, 128>}, {transform_indices = @transform_1, window_bounds = array<i64: 16, 128>}, {transform_indices = @transform_2, window_bounds = array<i64: 1, 2, 1>}, {transform_indices = @transform_3, window_bounds = array<i64: 1, 2, 1>}]} {
    %c1_i32 = arith.constant 1 : i32
    %0 = arith.muli %arg0, %c1_i32 : i32
    %1 = arith.addi %0, %arg1 : i32
    %c0_i32 = arith.constant 0 : i32
    %2 = arith.cmpi eq, %arg1, %c0_i32 : i32
    %3 = arith.extui %2 : i1 to i32
    %c0_i32_0 = arith.constant 0 : i32
    %4 = arith.cmpi ne, %3, %c0_i32_0 : i32
    scf.if %4 {
      %cst_4 = arith.constant -1.000000e+30 : f32
      %12 = vector.broadcast %cst_4 : f32 to vector<1x2x1xf32>
      %c0_5 = arith.constant 0 : index
      %c0_6 = arith.constant 0 : index
      %c0_7 = arith.constant 0 : index
      %13 = vector.load %arg4[%c0_5, %c0_6, %c0_7] : memref<1x2x1xf32, #tpu.memory_space<vmem>>, vector<1x2x1xf32>
      tpu.vector_store %arg4[%c0_5, %c0_6, %c0_7], %12 {strides = array<i32>} : memref<1x2x1xf32, #tpu.memory_space<vmem>>, vector<1x2x1xf32>,
      %cst_8 = arith.constant 0.000000e+00 : f32
      %14 = vector.broadcast %cst_8 : f32 to vector<1x2x1xf32>
      %c0_9 = arith.constant 0 : index
      %c0_10 = arith.constant 0 : index
      %c0_11 = arith.constant 0 : index
      %15 = vector.load %arg5[%c0_9, %c0_10, %c0_11] : memref<1x2x1xf32, #tpu.memory_space<vmem>>, vector<1x2x1xf32>
      tpu.vector_store %arg5[%c0_9, %c0_10, %c0_11], %14 {strides = array<i32>} : memref<1x2x1xf32, #tpu.memory_space<vmem>>, vector<1x2x1xf32>,
    } else {
    }
    %c0 = arith.constant 0 : index
    %c0_1 = arith.constant 0 : index
    %5 = vector.load %arg2[%c0, %c0_1] : memref<2x128xf32, #tpu.memory_space<vmem>>, vector<2x128xf32>
    %cst = arith.constant 2.000000e+00 : f32
    %6 = vector.broadcast %cst : f32 to vector<2x128xf32>
    %7 = arith.mulf %5, %6 : vector<2x128xf32>
    %8 = arith.truncf %7 : vector<2x128xf32> to vector<2x128xbf16>
    %c0_i32_2 = arith.constant 0 : i32
    %9 = arith.cmpi eq, %1, %c0_i32_2 : i32
    %10 = arith.extui %9 : i1 to i32
    %c0_i32_3 = arith.constant 0 : i32
    %11 = arith.cmpi ne, %10, %c0_i32_3 : i32
    scf.if %11 {
      %c0_4 = arith.constant 0 : index
      %c0_5 = arith.constant 0 : index
      %12 = vector.load %arg3[%c0_4, %c0_5] : memref<16x128xbf16, #tpu.memory_space<vmem>>, vector<16x128xbf16>
      %cst_6 = arith.constant dense<0.000000e+00> : vector<2x16xf32>
      %13 = tpu.matmul %8, %12, %cst_6 {dimension_numbers = #tpu.dot_dimension_numbers<[1], [1], [0], [0], [0, 0, 1, 0], [], []>} : vector<2x128xbf16>, vector<16x128xbf16>, vector<2x16xf32> -> vector<2x16xf32>
      %14 = tpu.iota {dimensions = array<i32: 1>} : vector<2x16xi32>
      %c0_i32_7 = arith.constant 0 : i32
      %15 = vector.broadcast %c0_i32_7 : i32 to vector<2x16xi32>
      %16 = arith.addi %15, %14 : vector<2x16xi32>
      %c4_i32 = arith.constant 4 : i32
      %17 = vector.broadcast %c4_i32 : i32 to vector<2x16xi32>
      %18 = arith.cmpi slt, %16, %17 : vector<2x16xi32>
      %cst_8 = arith.constant 0xFF800000 : f32
      %19 = vector.broadcast %cst_8 : f32 to vector<2x16xf32>
      %20 = arith.select %18, %13, %19 : vector<2x16xi1>, vector<2x16xf32>
      %c0_9 = arith.constant 0 : index
      %c0_10 = arith.constant 0 : index
      %c0_11 = arith.constant 0 : index
      %21 = vector.load %arg4[%c0_9, %c0_10, %c0_11] : memref<1x2x1xf32, #tpu.memory_space<vmem>>, vector<1x2x1xf32>
      %22 = vector.shape_cast %21 : vector<1x2x1xf32> to vector<2x1xf32>
      %cst_12 = arith.constant dense<0xFF800000> : vector<2xf32>
      %23 = vector.multi_reduction <maximumf>, %20, %cst_12 [1] : vector<2x16xf32> to vector<2xf32>
      %24 = vector.shape_cast %23 : vector<2xf32> to vector<2x1xf32>
      %25 = arith.maximumf %22, %24 : vector<2x1xf32>
      %c0_13 = arith.constant 0 : index
      %c0_14 = arith.constant 0 : index
      %c0_15 = arith.constant 0 : index
      %26 = vector.load %arg5[%c0_13, %c0_14, %c0_15] : memref<1x2x1xf32, #tpu.memory_space<vmem>>, vector<1x2x1xf32>
      %27 = vector.shape_cast %26 : vector<1x2x1xf32> to vector<2x1xf32>
      %28 = arith.subf %22, %25 : vector<2x1xf32>
      %29 = math.exp %28 : vector<2x1xf32>
      %30 = arith.mulf %27, %29 : vector<2x1xf32>
      %31 = vector.broadcast %25 : vector<2x1xf32> to vector<2x16xf32>
      %32 = arith.subf %20, %31 : vector<2x16xf32>
      %33 = math.exp %32 : vector<2x16xf32>
      %cst_16 = arith.constant dense<0.000000e+00> : vector<2xf32>
      %34 = vector.multi_reduction <add>, %33, %cst_16 [1] : vector<2x16xf32> to vector<2xf32>
      %35 = vector.shape_cast %34 : vector<2xf32> to vector<2x1xf32>
      %36 = arith.addf %30, %35 : vector<2x1xf32>
      %c0_17 = arith.constant 0 : index
      %c0_18 = arith.constant 0 : index
      %c0_19 = arith.constant 0 : index
      %37 = vector.load %arg5[%c0_17, %c0_18, %c0_19] : memref<1x2x1xf32, #tpu.memory_space<vmem>>, vector<1x2x1xf32>
      %38 = vector.shape_cast %37 : vector<1x2x1xf32> to vector<2x1xf32>
      %39 = vector.shape_cast %36 : vector<2x1xf32> to vector<1x2x1xf32>
      tpu.vector_store %arg5[%c0_17, %c0_18, %c0_19], %39 {strides = array<i32>} : memref<1x2x1xf32, #tpu.memory_space<vmem>>, vector<1x2x1xf32>,
      %c0_20 = arith.constant 0 : index
      %c0_21 = arith.constant 0 : index
      %c0_22 = arith.constant 0 : index
      %40 = vector.load %arg4[%c0_20, %c0_21, %c0_22] : memref<1x2x1xf32, #tpu.memory_space<vmem>>, vector<1x2x1xf32>
      %41 = vector.shape_cast %40 : vector<1x2x1xf32> to vector<2x1xf32>
      %42 = vector.shape_cast %25 : vector<2x1xf32> to vector<1x2x1xf32>
      tpu.vector_store %arg4[%c0_20, %c0_21, %c0_22], %42 {strides = array<i32>} : memref<1x2x1xf32, #tpu.memory_space<vmem>>, vector<1x2x1xf32>,
    } else {
    }
    return
  }
  func.func @transform_0(%arg0: i32, %arg1: i32) -> (i32, i32) {
    %c0_i32 = arith.constant 0 : i32
    %c0_i32_0 = arith.constant 0 : i32
    %c0_i32_1 = arith.constant 0 : i32
    return %c0_i32, %c0_i32_0 : i32, i32
  }
  func.func @transform_1(%arg0: i32, %arg1: i32) -> (i32, i32) {
    %c1_i32 = arith.constant 1 : i32
    %0 = arith.muli %arg0, %c1_i32 : i32
    %1 = arith.addi %0, %arg1 : i32
    %c0_i32 = arith.constant 0 : i32
    %2 = arith.minsi %1, %c0_i32 : i32
    %c0_i32_0 = arith.constant 0 : i32
    %c0_i32_1 = arith.constant 0 : i32
    return %2, %c0_i32_0 : i32, i32
  }
  func.func @transform_2(%arg0: i32, %arg1: i32) -> (i32, i32, i32) {
    %c0_i32 = arith.constant 0 : i32
    %c0_i32_0 = arith.constant 0 : i32
    %c0_i32_1 = arith.constant 0 : i32
    return %arg0, %c0_i32, %c0_i32_0 : i32, i32, i32
  }
  func.func @transform_3(%arg0: i32, %arg1: i32) -> (i32, i32, i32) {
    %c0_i32 = arith.constant 0 : i32
    %c0_i32_0 = arith.constant 0 : i32
    %c0_i32_1 = arith.constant 0 : i32
    return %arg0, %c0_i32, %c0_i32_0 : i32, i32, i32
  }
}

</mosaic_0001>

<bundles_post_ra>
// kernel: contrastive_forward.3
= control target key start
LH: loop header
LB: loop body
LE: loop exit
PB: predicated region body
PF: predicated region fallthrough
CT: control target
= control target key end

     0   :  { %s506_s12 = smov 0   ;;  %s508_s13 = smov 0   ;;  %s568_s0 = inlined_call_operand.vmem [shape: f32[2,128], index: 0, kind: input, shape index: {}]   ;;  %s569_s1 = inlined_call_operand.vmem [shape: bf16[16,128], index: 1, kind: input, shape index: {}]   ;;  %s570_s2 = inlined_call_operand.vmem [shape: f32[2,2,1], index: 2, kind: output, shape index: {0}]   ;;  %s571_s3 = inlined_call_operand.vmem [shape: f32[2,2,1], index: 3, kind: output, shape index: {1}]  }
   0x1   :  { %s510_s14 = smov 0  }
   0x2 LB: > { %s26_s15 = sadd.s32 1, %s475_s13  ;;  %p405_p0 = scmp.ge.s32.totalorder %s479_s14, 1  ;;  %s479_s14 = sphi %s510_s14, %s14_s14   ;;  %s475_s13 = sphi %s508_s13, %s573_s13   ;;  %s471_s12 = sphi %s506_s12, %s572_s12  }
   0x3   : > { %p28_p1 = scmp.ge.s32.totalorder %s26_s15, 2  ;;  %p165_p2 = scmp.lt.s32.totalorder %s479_s14, 3 }
   0x5   : > { %s575_s15 = smov (%p28_p1, %s26_s15), 0  ;;  %p166_p3 = pnand %p405_p0, %p165_p2 }
   0x6   : > { %p196_p4 = scmp.lt.s32.totalorder (!%p166_p3), %s471_s12, 0  ;;  %p207_p5 = scmp.lt.s32.totalorder (!%p166_p3), %s471_s12, 1  ;;  %v224_v0 = vld [vmem:[%s568_s0] sm:$0x3] (!%p166_p3)  ;;  %vm221_vm0 = vcmask (!%p166_p3), 1024   ;;  %v482_v4 = vmov (!%p166_p3), 0.0  }
   0x7   : > { %169 = sbr.rel (%p166_p3) target bundleno = 677 (0x2a5), region = 28  ;;  %v225_v1 = vmul.f32 (!%p166_p3), 2.0, %v224_v0  ;;  %v481_v3 = vmov (!%p166_p3), -1e+30   ;;  %p410_p7 = scmp.ne.s32.totalorder (!%p166_p3), %s471_s12, 0 }
   0x9   : > { %v226_v2 = vpack.c.bf16 (!%p166_p3), %v225_v1, %v225_v1 }
   0xe   : > { %s197_s18 = scalar_select %p196_p4, %s471_s12, 0 }
   0xf   : > { %s208_s19 = scalar_select %p207_p5, %s471_s12, 1 }
  0x10   : > { %s406_s20 = sshll.u32 %s197_s18, 1  ;;  %230 = sbr.rel (%p410_p7) target bundleno = 677 (0x2a5), region = 36  ;;  %v483_v6 = vmov (!%p410_p7), 0.0   ;;  %vm484_vm1 = vmmov (!%p410_p7), 0   ;;  %v279_v7 = vlaneseq (!%p410_p7)  ;;  %vm284_vm3 = vcmask (!%p410_p7), 123904  }
  0x11   : > { %p199_p6 = scmp.lt.s32.totalorder %s406_s20, 1  ;;  %s408_s21 = sshll.u32 %s208_s19, 1  ;;  %416 = vmatprep.subr.bf16.mxu0 (!%p410_p7), %v483_v6  ;;  %418 = vmatprep.mubr.msk.bf16.mxu0 (!%p410_p7), %vm484_vm1, %v483_v6  ;;  %v485_v15 = vmov (!%p410_p7), 0  }
  0x12   : > { %s536_s24 = scalar_lea.vmem %s570_s2, %s408_s21  ;;  %s541_s27 = scalar_lea.vmem %s571_s3, %s408_s21  ;;  %v280_v8 = vand.u32 (!%p410_p7), 127, %v279_v7  ;;  %451 = vset.pattern.permute.xlu0 (!%p410_p7), %v485_v15 }
  0x13   : > { %s577_s20 = smov (!%p199_p6, %s406_s20), 1  ;;  %222 = vst.msk [vmem:[%s536_s24] sm:$0x3] %vm221_vm0, %v481_v3  ;;  %223 = vst.msk [vmem:[%s541_s27] sm:$0x3] %vm221_vm0, %v482_v4 }
  0x14   : > { %s407_s28 = sshll.u32 %s577_s20, 2  ;;  %vm281_vm2 = vcmp.lt.s32.totalorder (!%p410_p7), %v280_v8, 4 }
  0x15   : > { %s202_s4 = scalar_lea.vmem %s569_s1, %s407_s28 }
  0x16   : > { %v452_v5 = vld [vmem:[%s202_s4] sm:$0xff] (!%p410_p7)  }
  0x17   : > { %417 = vmatpush3.bf16.xpose.msra.mxu0 %v452_v5 }
  0x1a   : > { %v283_v16 = vld [vmem:[%s536_s24] sm:$0x3] }
  0x1b   : > { %v289_v27 = vld [vmem:[%s541_s27] sm:$0x3] }
  0x1e   : > { %419 = vmatmul.mubr.bf16.vlgmr.msra.gmra.mrb[0].mxu0 %v226_v2 }
  0xf1   : > { %v273_v9 = vpop.f32.mrb[0].mxu0 }
  0xf2   : > { %v282_v10 = vsel %vm281_vm2, %v273_v9, -inf  ;;  %v420_v11 = vpop.f32.mrb[1].mxu0 }
  0xf3   : > { %v276_v12 = vpop.f32.mrb[2].mxu0  ;;  %v285_v13 = vsel %vm284_vm3, %v282_v10, -inf }
  0xf4   : > { %286 = vmax.xlane.f32.xlu0 %v285_v13  ;;  %v421_v14 = vpop.f32.mrb[3].mxu0 }
 0x181   : > { %v287_v17 = vpop.xlane.xlu0 %286 }
 0x182   : > { %v288_v18 = vmax.f32 %v283_v16, %v287_v17 }
 0x184   : > { %v290_v19 = vsub.f32 %v283_v16, %v288_v18  ;;  %308 = vst.msk [vmem:[%s536_s24] sm:$0x3] %vm221_vm0, %v288_v18  ;;  %296 = vperm.xlu0 %451, %v288_v18  }
 0x186   : > { %v291_v25 = vmul.f32 1.442695, %v290_v19 }
 0x203   : > { %v297_v20 = vpop.permute.xlu0 %296 }
 0x204   : > { %v299_v21 = vsub.f32 %v282_v10, %v297_v20 }
 0x206   : > { %v300_v22 = vmul.f32 1.442695, %v299_v21 }
 0x208   : > { %453 = vpow2.f32 %v300_v22 }
 0x209   : > { %455 = vpow2.f32 %v291_v25 }
 0x212   : > { %v454_v23 = vpop.eup %453 }
 0x213   : > { %v302_v24 = vsel %vm284_vm3, %v454_v23, 0.0  ;;  %v456_v26 = vpop.eup %455 }
 0x214   : > { %303 = vadd.xlane.f32.xlu1 %v302_v24  ;;  %v293_v28 = vmul.f32 %v456_v26, %v289_v27 }
 0x2a1   : > { %v304_v29 = vpop.xlane.xlu1 %303 }
 0x2a2   : > { %v305_v30 = vadd.f32 %v304_v29, %v293_v28 }
 0x2a4   : > { %307 = vst.msk [vmem:[%s541_s27] sm:$0x3] %vm221_vm0, %v305_v30 }
 0x2a5 PF: > { %s14_s14 = sadd.s32 1, %s479_s14   ;;  %s572_s12 = smov %s475_s13 }
 0x2a6   : > { %p11_p8 = scmp.ge.s32.totalorder %s14_s14, 4   ;;  %s573_s13 = smov %s575_s15 }
 0x2a8   :  { %13 = sbr.rel (!%p11_p8) target bundleno = 2 (0x2), region = 78 }

// kernel: contrastive_forward.2
= control target key start
LH: loop header
LB: loop body
LE: loop exit
PB: predicated region body
PF: predicated region fallthrough
CT: control target
= control target key end

     0   :  { %vm2095_vm0 = vmmov 0   ;;  %s2594_s1 = inlined_call_operand.vmem [shape: bf16[2048,128], index: 1, kind: input, shape index: {}]   ;;  %s2595_s0 = inlined_call_operand.vmem [shape: bf16[16,2048], index: 0, kind: input, shape index: {}]   ;;  %s2596_s3 = inlined_call_operand.vmem [shape: bf16[128,128], index: 3, kind: input, shape index: {}]   ;;  %s2597_s2 = inlined_call_operand.vmem [shape: f32[1,128], index: 2, kind: input, shape index: {}]   ;;  %s2598_s4 = inlined_call_operand.vmem [shape: f32[1,128], index: 4, kind: input, shape index: {}]   ;;  %s2599_s5 = inlined_call_operand.vmem [shape: f32[16,128], index: 5, kind: output, shape index: {}]  }
   0x1   :  { %v1958_v0 = vld [vmem:[%s2594_s1 + $0x40] sm:$0xff]   ;;  %v1962_v4 = vld [vmem:[%s2594_s1 + $0x48] sm:$0xff]   ;;  %v1966_v8 = vld [vmem:[%s2594_s1 + $0x50] sm:$0xff]  }
   0x2   :  { %v1959_v1 = vld [vmem:[%s2594_s1 + $0xc0] sm:$0xff]   ;;  %1751 = vmatprep.subr.bf16.mxu0 %v1958_v0  ;;  %v1963_v5 = vld [vmem:[%s2594_s1 + $0xc8] sm:$0xff]   ;;  %v1967_v9 = vld [vmem:[%s2594_s1 + $0xd0] sm:$0xff]  }
   0x3   :  { %v1960_v2 = vld [vmem:[%s2594_s1] sm:$0xff]   ;;  %1773 = vmatprep.subr.bf16.mxu1 %v1959_v1  ;;  %v1964_v6 = vld [vmem:[%s2594_s1 + $0x8] sm:$0xff]   ;;  %v1968_v10 = vld [vmem:[%s2594_s1 + $0x10] sm:$0xff]  }
   0x4   :  { %v1961_v3 = vld [vmem:[%s2594_s1 + $0x80] sm:$0xff]   ;;  %1752 = vmatpush3.bf16.msra.mxu0 %v1960_v2  ;;  %v1965_v7 = vld [vmem:[%s2594_s1 + $0x88] sm:$0xff]   ;;  %v1969_v11 = vld [vmem:[%s2594_s1 + $0x90] sm:$0xff]  }
   0x5   :  { %1774 = vmatpush3.bf16.msra.mxu1 %v1961_v3  ;;  %1753 = vmatprep.subr.bf16.mxu0 %v1962_v4  ;;  %v1970_v12 = vld [vmem:[%s2594_s1 + $0x58] sm:$0xff]   ;;  %v1974_v16 = vld [vmem:[%s2594_s1 + $0x60] sm:$0xff]   ;;  %v1978_v20 = vld [vmem:[%s2594_s1 + $0x68] sm:$0xff]  }
   0x6   :  { %1775 = vmatprep.subr.bf16.mxu1 %v1963_v5  ;;  %v1971_v13 = vld [vmem:[%s2594_s1 + $0xd8] sm:$0xff]   ;;  %v1975_v17 = vld [vmem:[%s2594_s1 + $0xe0] sm:$0xff]   ;;  %v1979_v21 = vld [vmem:[%s2594_s1 + $0xe8] sm:$0xff]  }
   0x7   :  { %v1972_v14 = vld [vmem:[%s2594_s1 + $0x18] sm:$0xff]   ;;  %v1976_v18 = vld [vmem:[%s2594_s1 + $0x20] sm:$0xff]   ;;  %v1980_v22 = vld [vmem:[%s2594_s1 + $0x28] sm:$0xff]  }
   0x8   :  { %1754 = vmatpush3.bf16.msra.mxu0 %v1964_v6  ;;  %v1973_v15 = vld [vmem:[%s2594_s1 + $0x98] sm:$0xff]   ;;  %v1977_v19 = vld [vmem:[%s2594_s1 + $0xa0] sm:$0xff]   ;;  %v1981_v23 = vld [vmem:[%s2594_s1 + $0xa8] sm:$0xff]  }
   0x9   :  { %1776 = vmatpush3.bf16.msra.mxu1 %v1965_v7  ;;  %1755 = vmatprep.subr.bf16.mxu0 %v1966_v8  ;;  %v1982_v24 = vld [vmem:[%s2594_s1 + $0x70] sm:$0xff]   ;;  %v1986_v28 = vld [vmem:[%s2594_s1 + $0x78] sm:$0xff]   ;;  %v21_v32 = vld [vmem:[%s2595_s0] sm:$0xff] }
   0xa   :  { %1777 = vmatprep.subr.bf16.mxu1 %v1967_v9  ;;  %v1983_v25 = vld [vmem:[%s2594_s1 + $0xf0] sm:$0xff]   ;;  %v1987_v29 = vld [vmem:[%s2594_s1 + $0xf8] sm:$0xff]   ;;  %v29_v33 = vld [vmem:[%s2595_s0 + $0x40] sm:$0xff] }
   0xb   :  { %v1984_v26 = vld [vmem:[%s2594_s1 + $0x30] sm:$0xff]   ;;  %v1988_v30 = vld [vmem:[%s2594_s1 + $0x38] sm:$0xff]   ;;  %v22_v34 = vld [vmem:[%s2595_s0 + $0x8] sm:$0xff]  ;;  %v1598_v35 = vcombine.low %v21_v32, %v29_v33  ;;  %v1599_v36 = vcombine.high %v21_v32, %v29_v33 }
   0xc   :  { %1756 = vmatpush3.bf16.msra.mxu0 %v1968_v10  ;;  %v1985_v27 = vld [vmem:[%s2594_s1 + $0xb0] sm:$0xff]   ;;  %v1989_v31 = vld [vmem:[%s2594_s1 + $0xb8] sm:$0xff]   ;;  %v30_v37 = vld [vmem:[%s2595_s0 + $0x48] sm:$0xff] }
   0xd   :  { %1778 = vmatpush3.bf16.msra.mxu1 %v1969_v11  ;;  %1757 = vmatprep.subr.bf16.mxu0 %v1970_v12  ;;  %v1600_v38 = vcombine.low %v22_v34, %v30_v37  ;;  %v1601_v39 = vcombine.high %v22_v34, %v30_v37  ;;  %v1990_v40 = vld [vmem:[%s2594_s1 + $0x140] sm:$0xff]   ;;  %v1994_v44 = vld [vmem:[%s2594_s1 + $0x148] sm:$0xff]   ;;  %v1998_v48 = vld [vmem:[%s2594_s1 + $0x150] sm:$0xff]  }
   0xe   :  { %1779 = vmatprep.subr.bf16.mxu1 %v1971_v13  ;;  %1180 = vmatprep.mubr.bf16.mxu0 %v1599_v36  ;;  %v1991_v41 = vld [vmem:[%s2594_s1 + $0x1c0] sm:$0xff]   ;;  %v1995_v45 = vld [vmem:[%s2594_s1 + $0x1c8] sm:$0xff]   ;;  %v1999_v49 = vld [vmem:[%s2594_s1 + $0x1d0] sm:$0xff]  }
   0xf   :  { %1221 = vmatprep.mubr.bf16.mxu1 %v1601_v39  ;;  %v1992_v42 = vld [vmem:[%s2594_s1 + $0x100] sm:$0xff]   ;;  %v1996_v46 = vld [vmem:[%s2594_s1 + $0x108] sm:$0xff]   ;;  %v2000_v50 = vld [vmem:[%s2594_s1 + $0x110] sm:$0xff]  }
  0x10   :  { %1758 = vmatpush3.bf16.msra.mxu0 %v1972_v14  ;;  %v1993_v43 = vld [vmem:[%s2594_s1 + $0x180] sm:$0xff]   ;;  %v1997_v47 = vld [vmem:[%s2594_s1 + $0x188] sm:$0xff]   ;;  %v2001_v51 = vld [vmem:[%s2594_s1 + $0x190] sm:$0xff]  }
  0x11   :  { %1780 = vmatpush3.bf16.msra.mxu1 %v1973_v15  ;;  %1759 = vmatprep.subr.bf16.mxu0 %v1974_v16  ;;  %v2002_v52 = vld [vmem:[%s2594_s1 + $0x158] sm:$0xff]   ;;  %v2006_v56 = vld [vmem:[%s2594_s1 + $0x160] sm:$0xff]   ;;  %v2010_v60 = vld [vmem:[%s2594_s1 + $0x168] sm:$0xff]  }
  0x12   :  { %1781 = vmatprep.subr.bf16.mxu1 %v1975_v17  ;;  %v2003_v53 = vld [vmem:[%s2594_s1 + $0x1d8] sm:$0xff]   ;;  %v2007_v57 = vld [vmem:[%s2594_s1 + $0x1e0] sm:$0xff]   ;;  %v2011_v61 = vld [vmem:[%s2594_s1 + $0x1e8] sm:$0xff]  }
  0x13   :  { %v2004_v54 = vld [vmem:[%s2594_s1 + $0x118] sm:$0xff]   ;;  %v2008_v58 = vld [vmem:[%s2594_s1 + $0x120] sm:$0xff]   ;;  %v2012_v62 = vld [vmem:[%s2594_s1 + $0x128] sm:$0xff]  }
  0x14   :  { %1760 = vmatpush3.bf16.msra.mxu0 %v1976_v18  ;;  %v2005_v55 = vld [vmem:[%s2594_s1 + $0x198] sm:$0xff]   ;;  %v2009_v59 = vld [vmem:[%s2594_s1 + $0x1a0] sm:$0xff]   ;;  %v2013_v63 = vld [vmem:[%s2594_s1 + $0x1a8] sm:$0xff]  }
  0x15   :  { %1782 = vmatpush3.bf16.msra.mxu1 %v1977_v19  ;;  %1761 = vmatprep.subr.bf16.mxu0 %v1978_v20  ;;  %v2014_v0 = vld [vmem:[%s2594_s1 + $0x170] sm:$0xff]   ;;  %v2018_v4 = vld [vmem:[%s2594_s1 + $0x178] sm:$0xff]   ;;  %v2022_v16 = vld [vmem:[%s2594_s1 + $0x240] sm:$0xff]  }
  0x16   :  { %1783 = vmatprep.subr.bf16.mxu1 %v1979_v21  ;;  %v2015_v1 = vld [vmem:[%s2594_s1 + $0x1f0] sm:$0xff]   ;;  %v2019_v5 = vld [vmem:[%s2594_s1 + $0x1f8] sm:$0xff]   ;;  %v2023_v17 = vld [vmem:[%s2594_s1 + $0x2c0] sm:$0xff]  }
  0x17   :  { %v2016_v2 = vld [vmem:[%s2594_s1 + $0x130] sm:$0xff]   ;;  %v2020_v6 = vld [vmem:[%s2594_s1 + $0x138] sm:$0xff]   ;;  %v2024_v18 = vld [vmem:[%s2594_s1 + $0x200] sm:$0xff]  }
  0x18   :  { %1762 = vmatpush3.bf16.msra.mxu0 %v1980_v22  ;;  %v2017_v3 = vld [vmem:[%s2594_s1 + $0x1b0] sm:$0xff]   ;;  %v2021_v7 = vld [vmem:[%s2594_s1 + $0x1b8] sm:$0xff]   ;;  %v2025_v19 = vld [vmem:[%s2594_s1 + $0x280] sm:$0xff]  }
  0x19   :  { %1784 = vmatpush3.bf16.msra.mxu1 %v1981_v23  ;;  %1763 = vmatprep.subr.bf16.mxu0 %v1982_v24  ;;  %v23_v8 = vld [vmem:[%s2595_s0 + $0x10] sm:$0xff]  ;;  %v24_v12 = vld [vmem:[%s2595_s0 + $0x18] sm:$0xff]  ;;  %v2026_v20 = vld [vmem:[%s2594_s1 + $0x248] sm:$0xff]  }
  0x1a   :  { %1785 = vmatprep.subr.bf16.mxu1 %v1983_v25  ;;  %v31_v9 = vld [vmem:[%s2595_s0 + $0x50] sm:$0xff]  ;;  %v32_v13 = vld [vmem:[%s2595_s0 + $0x58] sm:$0xff]  ;;  %v2027_v21 = vld [vmem:[%s2594_s1 + $0x2c8] sm:$0xff]  }
  0x1b   :  { %v1602_v10 = vcombine.low %v23_v8, %v31_v9  ;;  %v1603_v11 = vcombine.high %v23_v8, %v31_v9  ;;  %v1604_v14 = vcombine.low %v24_v12, %v32_v13  ;;  %v1605_v15 = vcombine.high %v24_v12, %v32_v13  ;;  %v2028_v22 = vld [vmem:[%s2594_s1 + $0x208] sm:$0xff]   ;;  %v2030_v24 = vld [vmem:[%s2594_s1 + $0x250] sm:$0xff]   ;;  %v2038_v32 = vld [vmem:[%s2594_s1 + $0x260] sm:$0xff]  }
  0x1c   :  { %1764 = vmatpush3.bf16.msra.mxu0 %v1984_v26  ;;  %v2029_v23 = vld [vmem:[%s2594_s1 + $0x288] sm:$0xff]   ;;  %v2031_v25 = vld [vmem:[%s2594_s1 + $0x2d0] sm:$0xff]   ;;  %v2039_v33 = vld [vmem:[%s2594_s1 + $0x2e0] sm:$0xff]  }
  0x1d   :  { %1786 = vmatpush3.bf16.msra.mxu1 %v1985_v27  ;;  %1765 = vmatprep.subr.bf16.mxu0 %v1986_v28  ;;  %v2032_v26 = vld [vmem:[%s2594_s1 + $0x210] sm:$0xff]   ;;  %v2034_v28 = vld [vmem:[%s2594_s1 + $0x258] sm:$0xff]   ;;  %v2040_v34 = vld [vmem:[%s2594_s1 + $0x220] sm:$0xff]  }
  0x1e   :  { %1787 = vmatprep.subr.bf16.mxu1 %v1987_v29  ;;  %v2033_v27 = vld [vmem:[%s2594_s1 + $0x290] sm:$0xff]   ;;  %v2035_v29 = vld [vmem:[%s2594_s1 + $0x2d8] sm:$0xff]   ;;  %v2042_v36 = vld [vmem:[%s2594_s1 + $0x268] sm:$0xff]  }
  0x1f   :  { %v2043_v37 = vld [vmem:[%s2594_s1 + $0x2e8] sm:$0xff]   ;;  %v2070_v8 = vld [vmem:[%s2594_s1 + $0x360] sm:$0xff]  }
  0x20   :  { %1766 = vmatpush3.bf16.msra.mxu0 %v1988_v30  ;;  %v2036_v30 = vld [vmem:[%s2594_s1 + $0x218] sm:$0xff]   ;;  %v2045_v39 = vld [vmem:[%s2594_s1 + $0x2a8] sm:$0xff]   ;;  %v2071_v9 = vld [vmem:[%s2594_s1 + $0x3e0] sm:$0xff]  }
  0x21   :  { %1788 = vmatpush3.bf16.msra.mxu1 %v1989_v31  ;;  %1795 = vmatprep.subr.bf16.mxu0 %v1990_v40  ;;  %v2037_v31 = vld [vmem:[%s2594_s1 + $0x298] sm:$0xff]   ;;  %v2046_v40 = vld [vmem:[%s2594_s1 + $0x270] sm:$0xff]   ;;  %v2074_v12 = vld [vmem:[%s2594_s1 + $0x368] sm:$0xff]  }
  0x22   :  { %1817 = vmatprep.subr.bf16.mxu1 %v1991_v41  ;;  %v2047_v41 = vld [vmem:[%s2594_s1 + $0x2f0] sm:$0xff]   ;;  %v2075_v13 = vld [vmem:[%s2594_s1 + $0x3e8] sm:$0xff]  }
  0x23   :  { %1181 = vmatmul.mubr.bf16.vlgmr.msra.gmra.mrb[0].mxu0 %v1598_v35  ;;  %v2041_v35 = vld [vmem:[%s2594_s1 + $0x2a0] sm:$0xff]  }
  0x24   :  { %1222 = vmatmul.mubr.bf16.vlgmr.msra.gmra.mrb[0].mxu1 %v1600_v38  ;;  %1796 = vmatpush3.bf16.msra.mxu0 %v1992_v42  ;;  %v2044_v38 = vld [vmem:[%s2594_s1 + $0x228] sm:$0xff]   ;;  %v2048_v42 = vld [vmem:[%s2594_s1 + $0x230] sm:$0xff]  }
  0x25   :  { %1818 = vmatpush3.bf16.msra.mxu1 %v1993_v43  ;;  %1797 = vmatprep.subr.bf16.mxu0 %v1994_v44  ;;  %v2049_v43 = vld [vmem:[%s2594_s1 + $0x2b0] sm:$0xff]   ;;  %v2050_v44 = vld [vmem:[%s2594_s1 + $0x278] sm:$0xff]  }
  0x26   :  { %1819 = vmatprep.subr.bf16.mxu1 %v1995_v45  ;;  %1262 = vmatprep.mubr.bf16.mxu0 %v1603_v11  ;;  %v2051_v45 = vld [vmem:[%s2594_s1 + $0x2f8] sm:$0xff]   ;;  %v2073_v11 = vld [vmem:[%s2594_s1 + $0x3a0] sm:$0xff]  }
  0x27   :  { %1303 = vmatprep.mubr.bf16.mxu1 %v1605_v15  ;;  %v2077_v15 = vld [vmem:[%s2594_s1 + $0x3a8] sm:$0xff]  }
  0x28   :  { %1798 = vmatpush3.bf16.msra.mxu0 %v1996_v46  ;;  %v2052_v46 = vld [vmem:[%s2594_s1 + $0x238] sm:$0xff]  }
  0x29   :  { %1820 = vmatpush3.bf16.msra.mxu1 %v1997_v47  ;;  %1799 = vmatprep.subr.bf16.mxu0 %v1998_v48  ;;  %v2053_v47 = vld [vmem:[%s2594_s1 + $0x2b8] sm:$0xff]   ;;  %v25_v48 = vld [vmem:[%s2595_s0 + $0x20] sm:$0xff] }
  0x2a   :  { %1821 = vmatprep.subr.bf16.mxu1 %v1999_v49  ;;  %v33_v49 = vld [vmem:[%s2595_s0 + $0x60] sm:$0xff] }
  0x2c   :  { %1800 = vmatpush3.bf16.msra.mxu0 %v2000_v50  ;;  %v26_v50 = vld [vmem:[%s2595_s0 + $0x28] sm:$0xff] }
  0x2d   :  { %1822 = vmatpush3.bf16.msra.mxu1 %v2001_v51  ;;  %1801 = vmatprep.subr.bf16.mxu0 %v2002_v52  ;;  %v34_v51 = vld [vmem:[%s2595_s0 + $0x68] sm:$0xff]  ;;  %v1606_v52 = vcombine.low %v25_v48, %v33_v49 }
  0x2e   :  { %1823 = vmatprep.subr.bf16.mxu1 %v2003_v53  ;;  %v1607_v53 = vcombine.high %v25_v48, %v33_v49 }
  0x30   :  { %1802 = vmatpush3.bf16.msra.mxu0 %v2004_v54  ;;  %v1608_v54 = vcombine.low %v26_v50, %v34_v51 }
  0x31   :  { %1824 = vmatpush3.bf16.msra.mxu1 %v2005_v55  ;;  %1803 = vmatprep.subr.bf16.mxu0 %v2006_v56  ;;  %v1609_v55 = vcombine.high %v26_v50, %v34_v51  ;;  %v2054_v56 = vld [vmem:[%s2594_s1 + $0x340] sm:$0xff]  }
  0x32   :  { %1825 = vmatprep.subr.bf16.mxu1 %v2007_v57  ;;  %v2055_v57 = vld [vmem:[%s2594_s1 + $0x3c0] sm:$0xff]  }
  0x34   :  { %1804 = vmatpush3.bf16.msra.mxu0 %v2008_v58  ;;  %v2056_v58 = vld [vmem:[%s2594_s1 + $0x300] sm:$0xff]  }
  0x35   :  { %1826 = vmatpush3.bf16.msra.mxu1 %v2009_v59  ;;  %1805 = vmatprep.subr.bf16.mxu0 %v2010_v60  ;;  %v2057_v59 = vld [vmem:[%s2594_s1 + $0x380] sm:$0xff]   ;;  %v2058_v60 = vld [vmem:[%s2594_s1 + $0x348] sm:$0xff]  }
  0x36   :  { %1827 = vmatprep.subr.bf16.mxu1 %v2011_v61  ;;  %v2059_v61 = vld [vmem:[%s2594_s1 + $0x3c8] sm:$0xff]  }
  0x38   :  { %1806 = vmatpush3.bf16.msra.mxu0 %v2012_v62  ;;  %v2060_v62 = vld [vmem:[%s2594_s1 + $0x308] sm:$0xff]  }
  0x39   :  { %1828 = vmatpush3.bf16.msra.mxu1 %v2013_v63  ;;  %1807 = vmatprep.subr.bf16.mxu0 %v2014_v0  ;;  %v2061_v63 = vld [vmem:[%s2594_s1 + $0x388] sm:$0xff]   ;;  %v2062_v0 = vld [vmem:[%s2594_s1 + $0x350] sm:$0xff]  }
  0x3a   :  { %1829 = vmatprep.subr.bf16.mxu1 %v2015_v1  ;;  %v2063_v1 = vld [vmem:[%s2594_s1 + $0x3d0] sm:$0xff]  }
  0x3c   :  { %1808 = vmatpush3.bf16.msra.mxu0 %v2016_v2  ;;  %v2064_v2 = vld [vmem:[%s2594_s1 + $0x310] sm:$0xff]  }
  0x3d   :  { %1830 = vmatpush3.bf16.msra.mxu1 %v2017_v3  ;;  %1809 = vmatprep.subr.bf16.mxu0 %v2018_v4  ;;  %v2065_v3 = vld [vmem:[%s2594_s1 + $0x390] sm:$0xff]   ;;  %v2066_v4 = vld [vmem:[%s2594_s1 + $0x358] sm:$0xff]  }
  0x3e   :  { %1831 = vmatprep.subr.bf16.mxu1 %v2019_v5  ;;  %v2067_v5 = vld [vmem:[%s2594_s1 + $0x3d8] sm:$0xff]  }
  0x40   :  { %1810 = vmatpush3.bf16.msra.mxu0 %v2020_v6  ;;  %v2068_v6 = vld [vmem:[%s2594_s1 + $0x318] sm:$0xff]  }
  0x41   :  { %1832 = vmatpush3.bf16.msra.mxu1 %v2021_v7  ;;  %1839 = vmatprep.subr.bf16.mxu0 %v2022_v16  ;;  %v2069_v7 = vld [vmem:[%s2594_s1 + $0x398] sm:$0xff]   ;;  %v2078_v16 = vld [vmem:[%s2594_s1 + $0x370] sm:$0xff]  }
  0x42   :  { %1861 = vmatprep.subr.bf16.mxu1 %v2023_v17  ;;  %v2079_v17 = vld [vmem:[%s2594_s1 + $0x3f0] sm:$0xff]  }
  0x43   :  { %1263 = vmatmul.mubr.bf16.vlgmr.msra.gmra.mrb[4].mxu0 %v1602_v10  ;;  %v2072_v10 = vld [vmem:[%s2594_s1 + $0x320] sm:$0xff]  }
  0x44   :  { %1304 = vmatmul.mubr.bf16.vlgmr.msra.gmra.mrb[4].mxu1 %v1604_v14  ;;  %1840 = vmatpush3.bf16.msra.mxu0 %v2024_v18  ;;  %v2076_v14 = vld [vmem:[%s2594_s1 + $0x328] sm:$0xff]   ;;  %v2080_v18 = vld [vmem:[%s2594_s1 + $0x330] sm:$0xff]  }
  0x45   :  { %1862 = vmatpush3.bf16.msra.mxu1 %v2025_v19  ;;  %1841 = vmatprep.subr.bf16.mxu0 %v2026_v20  ;;  %v2081_v19 = vld [vmem:[%s2594_s1 + $0x3b0] sm:$0xff]   ;;  %v2082_v20 = vld [vmem:[%s2594_s1 + $0x378] sm:$0xff]  }
  0x46   :  { %1863 = vmatprep.subr.bf16.mxu1 %v2027_v21  ;;  %1344 = vmatprep.mubr.bf16.mxu0 %v1607_v53  ;;  %v2083_v21 = vld [vmem:[%s2594_s1 + $0x3f8] sm:$0xff]  }
  0x47   :  { %1385 = vmatprep.mubr.bf16.mxu1 %v1609_v55 }
  0x48   :  { %1842 = vmatpush3.bf16.msra.mxu0 %v2028_v22  ;;  %v2084_v22 = vld [vmem:[%s2594_s1 + $0x338] sm:$0xff]  }
  0x49   :  { %1864 = vmatpush3.bf16.msra.mxu1 %v2029_v23  ;;  %1843 = vmatprep.subr.bf16.mxu0 %v2030_v24  ;;  %v2085_v23 = vld [vmem:[%s2594_s1 + $0x3b8] sm:$0xff]   ;;  %v27_v24 = vld [vmem:[%s2595_s0 + $0x30] sm:$0xff] }
  0x4a   :  { %1865 = vmatprep.subr.bf16.mxu1 %v2031_v25  ;;  %v35_v25 = vld [vmem:[%s2595_s0 + $0x70] sm:$0xff] }
  0x4c   :  { %1844 = vmatpush3.bf16.msra.mxu0 %v2032_v26  ;;  %v28_v26 = vld [vmem:[%s2595_s0 + $0x38] sm:$0xff] }
  0x4d   :  { %1866 = vmatpush3.bf16.msra.mxu1 %v2033_v27  ;;  %1845 = vmatprep.subr.bf16.mxu0 %v2034_v28  ;;  %v1610_v27 = vcombine.low %v27_v24, %v35_v25  ;;  %v1611_v28 = vcombine.high %v27_v24, %v35_v25 }
  0x4e   :  { %1867 = vmatprep.subr.bf16.mxu1 %v2035_v29  ;;  %v36_v29 = vld [vmem:[%s2595_s0 + $0x78] sm:$0xff] }
  0x50   :  { %1846 = vmatpush3.bf16.msra.mxu0 %v2036_v30  ;;  %v1612_v30 = vcombine.low %v28_v26, %v36_v29 }
  0x51   :  { %1868 = vmatpush3.bf16.msra.mxu1 %v2037_v31  ;;  %1847 = vmatprep.subr.bf16.mxu0 %v2038_v32  ;;  %v1613_v31 = vcombine.high %v28_v26, %v36_v29  ;;  %v2094_v32 = vmov 0.0  }
  0x52   :  { %1869 = vmatprep.subr.bf16.mxu1 %v2039_v33  ;;  %v2086_v33 = vld [vmem:[%s2596_s3] sm:$0xff]  }
  0x54   :  { %1848 = vmatpush3.bf16.msra.mxu0 %v2040_v34  ;;  %v2087_v34 = vld [vmem:[%s2596_s3 + $0x8] sm:$0xff]  }
  0x55   :  { %1870 = vmatpush3.bf16.msra.mxu1 %v2041_v35  ;;  %1849 = vmatprep.subr.bf16.mxu0 %v2042_v36  ;;  %v2088_v35 = vld [vmem:[%s2596_s3 + $0x10] sm:$0xff]   ;;  %v2089_v36 = vld [vmem:[%s2596_s3 + $0x18] sm:$0xff]  }
  0x56   :  { %1871 = vmatprep.subr.bf16.mxu1 %v2043_v37  ;;  %v2090_v37 = vld [vmem:[%s2596_s3 + $0x20] sm:$0xff]  }
  0x58   :  { %1850 = vmatpush3.bf16.msra.mxu0 %v2044_v38  ;;  %v2091_v38 = vld [vmem:[%s2596_s3 + $0x28] sm:$0xff]  }
  0x59   :  { %1872 = vmatpush3.bf16.msra.mxu1 %v2045_v39  ;;  %1851 = vmatprep.subr.bf16.mxu0 %v2046_v40  ;;  %v2092_v39 = vld [vmem:[%s2596_s3 + $0x30] sm:$0xff]   ;;  %v2093_v40 = vld [vmem:[%s2596_s3 + $0x38] sm:$0xff]  }
  0x5a   :  { %1873 = vmatprep.subr.bf16.mxu1 %v2047_v41 }
  0x5c   :  { %1852 = vmatpush3.bf16.msra.mxu0 %v2048_v42 }
  0x5d   :  { %1874 = vmatpush3.bf16.msra.mxu1 %v2049_v43  ;;  %1853 = vmatprep.subr.bf16.mxu0 %v2050_v44  ;;  %v1597_v43 = vld [vmem:[%s2597_s2] ss:$0 sm:$0xff] }
  0x5e   :  { %1875 = vmatprep.subr.bf16.mxu1 %v2051_v45 }
  0x60   :  { %1854 = vmatpush3.bf16.msra.mxu0 %v2052_v46 }
  0x61   :  { %1876 = vmatpush3.bf16.msra.mxu1 %v2053_v47  ;;  %1883 = vmatprep.subr.bf16.mxu0 %v2054_v56 }
  0x62   :  { %1905 = vmatprep.subr.bf16.mxu1 %v2055_v57 }
  0x63   :  { %1345 = vmatmul.mubr.bf16.vlgmr.msra.gmra.mrb[8].mxu0 %v1606_v52 }
  0x64   :  { %1386 = vmatmul.mubr.bf16.vlgmr.msra.gmra.mrb[8].mxu1 %v1608_v54  ;;  %1884 = vmatpush3.bf16.msra.mxu0 %v2056_v58 }
  0x65   :  { %1906 = vmatpush3.bf16.msra.mxu1 %v2057_v59  ;;  %1885 = vmatprep.subr.bf16.mxu0 %v2058_v60 }
  0x66   :  { %1907 = vmatprep.subr.bf16.mxu1 %v2059_v61  ;;  %1426 = vmatprep.mubr.bf16.mxu0 %v1611_v28 }
  0x67   :  { %1467 = vmatprep.mubr.bf16.mxu1 %v1613_v31 }
  0x68   :  { %1886 = vmatpush3.bf16.msra.mxu0 %v2060_v62 }
  0x69   :  { %1908 = vmatpush3.bf16.msra.mxu1 %v2061_v63  ;;  %1887 = vmatprep.subr.bf16.mxu0 %v2062_v0 }
  0x6a   :  { %1909 = vmatprep.subr.bf16.mxu1 %v2063_v1 }
  0x6c   :  { %1888 = vmatpush3.bf16.msra.mxu0 %v2064_v2 }
  0x6d   :  { %1910 = vmatpush3.bf16.msra.mxu1 %v2065_v3  ;;  %1889 = vmatprep.subr.bf16.mxu0 %v2066_v4 }
  0x6e   :  { %1911 = vmatprep.subr.bf16.mxu1 %v2067_v5 }
  0x70   :  { %1890 = vmatpush3.bf16.msra.mxu0 %v2068_v6 }
  0x71   :  { %1912 = vmatpush3.bf16.msra.mxu1 %v2069_v7  ;;  %1891 = vmatprep.subr.bf16.mxu0 %v2070_v8 }
  0x72   :  { %1913 = vmatprep.subr.bf16.mxu1 %v2071_v9 }
  0x74   :  { %1892 = vmatpush3.bf16.msra.mxu0 %v2072_v10 }
  0x75   :  { %1914 = vmatpush3.bf16.msra.mxu1 %v2073_v11  ;;  %1893 = vmatprep.subr.bf16.mxu0 %v2074_v12 }
  0x76   :  { %1915 = vmatprep.subr.bf16.mxu1 %v2075_v13 }
  0x78   :  { %1894 = vmatpush3.bf16.msra.mxu0 %v2076_v14 }
  0x79   :  { %1916 = vmatpush3.bf16.msra.mxu1 %v2077_v15  ;;  %1895 = vmatprep.subr.bf16.mxu0 %v2078_v16 }
  0x7a   :  { %1917 = vmatprep.subr.bf16.mxu1 %v2079_v17 }
  0x7c   :  { %1896 = vmatpush3.bf16.msra.mxu0 %v2080_v18 }
  0x7d   :  { %1918 = vmatpush3.bf16.msra.mxu1 %v2081_v19  ;;  %1897 = vmatprep.subr.bf16.mxu0 %v2082_v20 }
  0x7e   :  { %1919 = vmatprep.subr.bf16.mxu1 %v2083_v21 }
  0x80   :  { %1898 = vmatpush3.bf16.msra.mxu0 %v2084_v22 }
  0x81   :  { %1920 = vmatpush3.bf16.msra.mxu1 %v2085_v23  ;;  %1936 = vmatprep.subr.bf16.mxu0 %v2094_v32 }
  0x83   :  { %1427 = vmatmul.mubr.bf16.vlgmr.msra.gmra.mrb[12].mxu0 %v1610_v27 }
  0x84   :  { %1468 = vmatmul.mubr.bf16.vlgmr.msra.gmra.mrb[12].mxu1 %v1612_v30  ;;  %1937 = vmatpush3.bf16.msra.mxu0 %v2086_v33 }
  0x85   :  { %1938 = vmatprep.subr.bf16.mxu0 %v2094_v32  ;;  %1952 = vmatprep.mubr.msk.bf16.mxu0 %vm2095_vm0, %v2094_v32 }
  0x88   :  { %1939 = vmatpush3.bf16.msra.mxu0 %v2087_v34 }
  0x89   :  { %1940 = vmatprep.subr.bf16.mxu0 %v2094_v32 }
  0x8c   :  { %1941 = vmatpush3.bf16.msra.mxu0 %v2088_v35 }
  0x8d   :  { %1942 = vmatprep.subr.bf16.mxu0 %v2094_v32 }
  0x90   :  { %1943 = vmatpush3.bf16.msra.mxu0 %v2089_v36 }
  0x91   :  { %1944 = vmatprep.subr.bf16.mxu0 %v2094_v32 }
  0x94   :  { %1945 = vmatpush3.bf16.msra.mxu0 %v2090_v37 }
  0x95   :  { %1946 = vmatprep.subr.bf16.mxu0 %v2094_v32 }
  0x98   :  { %1947 = vmatpush3.bf16.msra.mxu0 %v2091_v38 }
  0x99   :  { %1948 = vmatprep.subr.bf16.mxu0 %v2094_v32 }
  0x9c   :  { %1949 = vmatpush3.bf16.msra.mxu0 %v2092_v39 }
  0x9d   :  { %1950 = vmatprep.subr.bf16.mxu0 %v2094_v32 }
  0xa0   :  { %1951 = vmatpush3.bf16.msra.mxu0 %v2093_v40 }
  0xf6   :  { %v1767_v41 = vpop.f32.mrb[0].mxu0 }
  0xf7   :  { %v1789_v42 = vpop.f32.mrb[0].mxu1  ;;  %v1768_v44 = vpop.f32.mrb[1].mxu0 }
  0xf8   :  { %v1769_v45 = vadd.f32 %v1768_v44, %v1767_v41  ;;  %v1790_v46 = vpop.f32.mrb[1].mxu1  ;;  %v1770_v47 = vpop.f32.mrb[2].mxu0 }
  0xf9   :  { %v1791_v48 = vadd.f32 %v1790_v46, %v1789_v42  ;;  %v1792_v49 = vpop.f32.mrb[2].mxu1  ;;  %v1771_v50 = vpop.f32.mrb[3].mxu0 }
  0xfa   :  { %v1183_v51 = vadd.f32 %v1769_v45, %v1597_v43  ;;  %v1772_v52 = vadd.f32 %v1771_v50, %v1770_v47  ;;  %v1793_v53 = vpop.f32.mrb[3].mxu1  ;;  %v1742_v45 = vld [vmem:[%s2598_s4] ss:$0 sm:$0xff] }
  0xfb   :  { %v1794_v54 = vadd.f32 %v1793_v53, %v1792_v49 }
  0xfc   :  { %v1224_v55 = vadd.f32 %v1791_v48, %v1183_v51  ;;  %v1186_v56 = vadd.f32 %v1772_v52, %v1597_v43 }
  0xfe   :  { %v1227_v57 = vadd.f32 %v1794_v54, %v1186_v56 }
 0x116   :  { %v1811_v58 = vpop.f32.mrb[4].mxu0 }
 0x117   :  { %v1833_v59 = vpop.f32.mrb[4].mxu1  ;;  %v1812_v60 = vpop.f32.mrb[5].mxu0 }
 0x118   :  { %v1813_v61 = vadd.f32 %v1812_v60, %v1811_v58  ;;  %v1834_v62 = vpop.f32.mrb[5].mxu1  ;;  %v1814_v63 = vpop.f32.mrb[6].mxu0 }
 0x119   :  { %v1835_v0 = vadd.f32 %v1834_v62, %v1833_v59  ;;  %v1836_v1 = vpop.f32.mrb[6].mxu1  ;;  %v1815_v2 = vpop.f32.mrb[7].mxu0 }
 0x11a   :  { %v1265_v3 = vadd.f32 %v1813_v61, %v1224_v55  ;;  %v1816_v4 = vadd.f32 %v1815_v2, %v1814_v63  ;;  %v1837_v5 = vpop.f32.mrb[7].mxu1 }
 0x11b   :  { %v1838_v6 = vadd.f32 %v1837_v5, %v1836_v1 }
 0x11c   :  { %v1306_v7 = vadd.f32 %v1835_v0, %v1265_v3  ;;  %v1268_v8 = vadd.f32 %v1816_v4, %v1227_v57 }
 0x11e   :  { %v1309_v9 = vadd.f32 %v1838_v6, %v1268_v8 }
 0x136   :  { %v1855_v10 = vpop.f32.mrb[8].mxu0 }
 0x137   :  { %v1877_v11 = vpop.f32.mrb[8].mxu1  ;;  %v1856_v12 = vpop.f32.mrb[9].mxu0 }
 0x138   :  { %v1878_v13 = vpop.f32.mrb[9].mxu1  ;;  %v1857_v14 = vadd.f32 %v1856_v12, %v1855_v10  ;;  %v1858_v16 = vpop.f32.mrb[10].mxu0 }
 0x139   :  { %v1879_v15 = vadd.f32 %v1878_v13, %v1877_v11  ;;  %v1880_v17 = vpop.f32.mrb[10].mxu1  ;;  %v1859_v18 = vpop.f32.mrb[11].mxu0 }
 0x13a   :  { %v1881_v19 = vpop.f32.mrb[11].mxu1  ;;  %v1347_v20 = vadd.f32 %v1857_v14, %v1306_v7  ;;  %v1860_v21 = vadd.f32 %v1859_v18, %v1858_v16 }
 0x13b   :  { %v1882_v22 = vadd.f32 %v1881_v19, %v1880_v17 }
 0x13c   :  { %v1388_v23 = vadd.f32 %v1879_v15, %v1347_v20  ;;  %v1350_v24 = vadd.f32 %v1860_v21, %v1309_v9 }
 0x13e   :  { %v1391_v25 = vadd.f32 %v1882_v22, %v1350_v24 }
 0x156   :  { %v1899_v26 = vpop.f32.mrb[12].mxu0 }
 0x157   :  { %v1921_v27 = vpop.f32.mrb[12].mxu1  ;;  %v1900_v28 = vpop.f32.mrb[13].mxu0 }
 0x158   :  { %v1901_v29 = vadd.f32 %v1900_v28, %v1899_v26  ;;  %v1922_v30 = vpop.f32.mrb[13].mxu1  ;;  %v1902_v31 = vpop.f32.mrb[14].mxu0 }
 0x159   :  { %v1923_v32 = vadd.f32 %v1922_v30, %v1921_v27  ;;  %v1924_v33 = vpop.f32.mrb[14].mxu1  ;;  %v1903_v34 = vpop.f32.mrb[15].mxu0 }
 0x15a   :  { %v1429_v35 = vadd.f32 %v1901_v29, %v1388_v23  ;;  %v1904_v36 = vadd.f32 %v1903_v34, %v1902_v31  ;;  %v1925_v37 = vpop.f32.mrb[15].mxu1 }
 0x15b   :  { %v1926_v38 = vadd.f32 %v1925_v37, %v1924_v33 }
 0x15c   :  { %v1470_v39 = vadd.f32 %v1923_v32, %v1429_v35  ;;  %v1432_v40 = vadd.f32 %v1904_v36, %v1391_v25 }
 0x15e   :  { %v1473_v41 = vadd.f32 %v1926_v38, %v1432_v40  ;;  %v1476_v42 = vmax.f32 %v1470_v39, 0.0 }
 0x160   :  { %v1477_v43 = vmax.f32 %v1473_v41, 0.0 }
 0x162   :  { %v1478_v44 = vpack.c.bf16 %v1477_v43, %v1476_v42 }
 0x164   :  { %1953 = vmatmul.mubr.bf16.vlgmr.msra.gmra.mrb[16].mxu0 %v1478_v44 }
 0x237   :  { %v1584_v46 = vpop.f32.mrb[16].mxu0 }
 0x238   :  { %v1585_v47 = vadd.f32 %v1742_v45, %v1584_v46  ;;  %v1954_v48 = vpop.f32.mrb[17].mxu0 }
 0x239   :  { %v1587_v49 = vpop.f32.mrb[18].mxu0 }
 0x23a   :  { %1591 = vst [vmem:[%s2599_s5] sm:$0xff] %v1585_v47  ;;  %v1588_v50 = vadd.f32 %v1742_v45, %v1587_v49  ;;  %v1955_v51 = vpop.f32.mrb[19].mxu0 }
 0x23c   :  { %1592 = vst [vmem:[%s2599_s5 + $0x8] sm:$0xff] %v1588_v50 }

</bundles_post_ra>
